<compile_context>
chip_gen: v7x
topology: tpu7x:2x2x1
jax: 0.10.0
libtpu: 0.0.40
codegen_flags: <defaults>
</compile_context>

<pallas_src>
import jax
import jax.numpy as jnp
from jax.experimental import pallas as pl
from jax.experimental.pallas import tpu as pltpu

H1, H2 = 30, 20        # torch hidden sizes
H1P, H2P = 32, 32      # sublane-friendly padded hidden sizes
LANE = 128             # lane width: padded output dim (lane-dense store)


def _round_up(x, m):
    return (x + m - 1) // m * m


def _pad_to(a, shape):
    return jnp.pad(a, [(0, t - s) for s, t in zip(a.shape, shape)])


def mlp_kernel(x_ref, w1_ref, b1_ref, w2_ref, b2_ref, w3_ref, b3_ref, o_ref):
    x = x_ref[...]                                                      # (tb, Din) bf16
    # Layer 1: x @ W1 + b1, ReLU  (f32 accumulate / elementwise on the VPU)
    h1 = jnp.dot(x, w1_ref[...], preferred_element_type=jnp.float32)   # (tb, H1P)
    h1 = jnp.maximum(h1 + b1_ref[...], 0.0).astype(jnp.bfloat16)
    # Layer 2
    h2 = jnp.dot(h1, w2_ref[...], preferred_element_type=jnp.float32)  # (tb, H2P)
    h2 = jnp.maximum(h2 + b2_ref[...], 0.0).astype(jnp.bfloat16)
    # Layer 3: logits, padded to LANE columns (extra cols are exactly 0)
    out = jnp.dot(h2, w3_ref[...], preferred_element_type=jnp.float32) + b3_ref[...]
    o_ref[...] = out.astype(o_ref.dtype)


def prepare_params(params, num_input, num_output):
    """One-time prep: transpose to (in, out), zero-pad to aligned extents, cast
    matmul operands to bf16 (biases stay f32)."""
    assert num_output <= LANE, "num_output > 128 would need an extra output tile"
    w1 = _pad_to(params["w1"].T.astype(jnp.float32), (num_input, H1P)).astype(jnp.bfloat16)
    w2 = _pad_to(params["w2"].T.astype(jnp.float32), (H1P, H2P)).astype(jnp.bfloat16)
    w3 = _pad_to(params["w3"].T.astype(jnp.float32), (H2P, LANE)).astype(jnp.bfloat16)
    b1 = _pad_to(params["b1"].reshape(1, -1).astype(jnp.float32), (1, H1P))
    b2 = _pad_to(params["b2"].reshape(1, -1).astype(jnp.float32), (1, H2P))
    b3 = _pad_to(params["b3"].reshape(1, -1).astype(jnp.float32), (1, LANE))
    return {"w1": w1, "b1": b1, "w2": w2, "b2": b2, "w3": w3, "b3": b3}


def mlp_forward(x, prepped, *, num_output, tile_b=512):
    """x: (B, num_input) f32.  prepped: output of prepare_params."""
    B, Din = x.shape
    tb = min(tile_b, _round_up(B, 8))          # batch tile (>= 8 sublanes)
    B_pad = _round_up(B, tb)
    x_p = _pad_to(x, (B_pad, Din)).astype(jnp.bfloat16)

    w1, b1 = prepped["w1"], prepped["b1"]
    w2, b2 = prepped["w2"], prepped["b2"]
    w3, b3 = prepped["w3"], prepped["b3"]

    full = lambda i: (0, 0)                    # weights/biases: resident whole-array blocks
    flops = 2 * B_pad * (Din * H1P + H1P * H2P + H2P * LANE)
    bytes_accessed = (x_p.size * 2 + B_pad * LANE * 4
                      + sum(int(a.size) * a.dtype.itemsize
                            for a in (w1, b1, w2, b2, w3, b3)))

    out = pl.pallas_call(
        mlp_kernel,
        out_shape=jax.ShapeDtypeStruct((B_pad, LANE), jnp.float32),
        grid=(B_pad // tb,),
        in_specs=[
            pl.BlockSpec((tb, Din), lambda i: (i, 0)),   # x: batch-tiled, pipelined
            pl.BlockSpec(w1.shape, full),
            pl.BlockSpec(b1.shape, full),
            pl.BlockSpec(w2.shape, full),
            pl.BlockSpec(b2.shape, full),
            pl.BlockSpec(w3.shape, full),
            pl.BlockSpec(b3.shape, full),
        ],
        out_specs=pl.BlockSpec((tb, LANE), lambda i: (i, 0)),
        compiler_params=pltpu.CompilerParams(dimension_semantics=("parallel",)),
        cost_estimate=pl.CostEstimate(flops=flops, transcendentals=0,
                                      bytes_accessed=bytes_accessed),
    )(x_p, w1, b1, w2, b2, w3, b3)
    return out[:B, :num_output]


def init_params(key, num_input, num_output):
    """Deterministic init mimicking torch.nn.Linear's U(-1/sqrt(fan_in), 1/sqrt(fan_in))."""
    def linear(k, fan_in, fan_out):
        kw, kb = jax.random.split(k)
        bound = 1.0 / jnp.sqrt(fan_in)
        w = jax.random.uniform(kw, (fan_out, fan_in), jnp.float32, -bound, bound)
        b = jax.random.uniform(kb, (fan_out,), jnp.float32, -bound, bound)
        return w, b

    k1, k2, k3 = jax.random.split(key, 3)
    w1, b1 = linear(k1, num_input, H1)
    w2, b2 = linear(k2, H1, H2)
    w3, b3 = linear(k3, H2, num_output)
    return {"w1": w1, "b1": b1, "w2": w2, "b2": b2, "w3": w3, "b3": b3}


def reference_forward_f32(x, p):
    h1 = jnp.maximum(x @ p["w1"].T + p["b1"], 0.0)
    h2 = jnp.maximum(h1 @ p["w2"].T + p["b2"], 0.0)
    return h2 @ p["w3"].T + p["b3"]


def reference_forward_bf16(x, p):
    """Numerics-matched reference (bf16 matmul inputs, f32 accumulate/elementwise)."""
    bf = jnp.bfloat16
    h1 = jnp.dot(x.astype(bf), p["w1"].T.astype(bf), preferred_element_type=jnp.float32)
    h1 = jnp.maximum(h1 + p["b1"], 0.0)
    h2 = jnp.dot(h1.astype(bf), p["w2"].T.astype(bf), preferred_element_type=jnp.float32)
    h2 = jnp.maximum(h2 + p["b2"], 0.0)
    out = jnp.dot(h2.astype(bf), p["w3"].T.astype(bf), preferred_element_type=jnp.float32)
    return out + p["b3"]


if __name__ == "__main__":
    key = jax.random.PRNGKey(0)
    k_params, k_x = jax.random.split(key)

    batch, num_input, num_output = 8, 64, 10
    params = init_params(k_params, num_input, num_output)
    x = jax.random.normal(k_x, (batch, num_input), jnp.float32)

    prepped = prepare_params(params, num_input, num_output)
    logits = mlp_forward(x, prepped, num_output=num_output)
    jax.block_until_ready(logits)

    assert logits.shape == (batch, num_output)
    # vs. numerics-matched bf16 reference: tight tolerance
    ref_bf16 = reference_forward_bf16(x, params)
    assert jnp.allclose(logits, ref_bf16, atol=1e-3, rtol=1e-3), \
        float(jnp.max(jnp.abs(logits - ref_bf16)))
    # vs. pure-f32 torch-equivalent reference: bf16-input tolerance
    ref_f32 = reference_forward_f32(x, params)
    assert jnp.allclose(logits, ref_f32, atol=5e-2, rtol=5e-2), \
        float(jnp.max(jnp.abs(logits - ref_f32)))

    print("KERNEL_OK")
</pallas_src>

<mosaic_0001>
module attributes {stable_mosaic.version = 11 : i64} {
  func.func @mlp_kernel(%arg0: i32, %arg1: memref<8x64xbf16, #tpu.memory_space<vmem>>, %arg2: memref<64x32xbf16, #tpu.memory_space<vmem>>, %arg3: memref<1x32xf32, #tpu.memory_space<vmem>>, %arg4: memref<32x32xbf16, #tpu.memory_space<vmem>>, %arg5: memref<1x32xf32, #tpu.memory_space<vmem>>, %arg6: memref<32x128xbf16, #tpu.memory_space<vmem>>, %arg7: memref<1x128xf32, #tpu.memory_space<vmem>>, %arg8: memref<8x128xf32, #tpu.memory_space<vmem>>) attributes {dimension_semantics = [#tpu.dimension_semantics<parallel>], iteration_bounds = array<i64: 1>, scalar_prefetch = 0 : i64, scratch_operands = 0 : i64, tpu.core_type = #tpu.core_type<tc>, window_params = [{transform_indices = @transform_0, window_bounds = array<i64: 8, 64>}, {pipeline_mode = #tpu.pipeline_mode<synchronous>, transform_indices = @transform_1, window_bounds = array<i64: 64, 32>}, {pipeline_mode = #tpu.pipeline_mode<synchronous>, transform_indices = @transform_2, window_bounds = array<i64: 1, 32>}, {pipeline_mode = #tpu.pipeline_mode<synchronous>, transform_indices = @transform_3, window_bounds = array<i64: 32, 32>}, {pipeline_mode = #tpu.pipeline_mode<synchronous>, transform_indices = @transform_4, window_bounds = array<i64: 1, 32>}, {pipeline_mode = #tpu.pipeline_mode<synchronous>, transform_indices = @transform_5, window_bounds = array<i64: 32, 128>}, {pipeline_mode = #tpu.pipeline_mode<synchronous>, transform_indices = @transform_6, window_bounds = array<i64: 1, 128>}, {transform_indices = @transform_7, window_bounds = array<i64: 8, 128>}]} {
    %c0 = arith.constant 0 : index
    %c0_0 = arith.constant 0 : index
    %0 = vector.load %arg1[%c0, %c0_0] : memref<8x64xbf16, #tpu.memory_space<vmem>>, vector<8x64xbf16>
    %c0_1 = arith.constant 0 : index
    %c0_2 = arith.constant 0 : index
    %1 = vector.load %arg2[%c0_1, %c0_2] : memref<64x32xbf16, #tpu.memory_space<vmem>>, vector<64x32xbf16>
    %cst = arith.constant dense<0.000000e+00> : vector<8x32xf32>
    %2 = tpu.matmul %0, %1, %cst {dimension_numbers = #tpu.dot_dimension_numbers<[1], [0], [0], [1], [0, 0, 1, 1], [], []>} : vector<8x64xbf16>, vector<64x32xbf16>, vector<8x32xf32> -> vector<8x32xf32>
    %c0_3 = arith.constant 0 : index
    %c0_4 = arith.constant 0 : index
    %3 = vector.load %arg3[%c0_3, %c0_4] : memref<1x32xf32, #tpu.memory_space<vmem>>, vector<1x32xf32>
    %4 = vector.broadcast %3 : vector<1x32xf32> to vector<8x32xf32>
    %5 = arith.addf %2, %4 : vector<8x32xf32>
    %cst_5 = arith.constant 0.000000e+00 : f32
    %6 = vector.broadcast %cst_5 : f32 to vector<8x32xf32>
    %7 = arith.maximumf %5, %6 : vector<8x32xf32>
    %8 = arith.truncf %7 : vector<8x32xf32> to vector<8x32xbf16>
    %c0_6 = arith.constant 0 : index
    %c0_7 = arith.constant 0 : index
    %9 = vector.load %arg4[%c0_6, %c0_7] : memref<32x32xbf16, #tpu.memory_space<vmem>>, vector<32x32xbf16>
    %cst_8 = arith.constant dense<0.000000e+00> : vector<8x32xf32>
    %10 = tpu.matmul %8, %9, %cst_8 {dimension_numbers = #tpu.dot_dimension_numbers<[1], [0], [0], [1], [0, 0, 1, 1], [], []>} : vector<8x32xbf16>, vector<32x32xbf16>, vector<8x32xf32> -> vector<8x32xf32>
    %c0_9 = arith.constant 0 : index
    %c0_10 = arith.constant 0 : index
    %11 = vector.load %arg5[%c0_9, %c0_10] : memref<1x32xf32, #tpu.memory_space<vmem>>, vector<1x32xf32>
    %12 = vector.broadcast %11 : vector<1x32xf32> to vector<8x32xf32>
    %13 = arith.addf %10, %12 : vector<8x32xf32>
    %cst_11 = arith.constant 0.000000e+00 : f32
    %14 = vector.broadcast %cst_11 : f32 to vector<8x32xf32>
    %15 = arith.maximumf %13, %14 : vector<8x32xf32>
    %16 = arith.truncf %15 : vector<8x32xf32> to vector<8x32xbf16>
    %c0_12 = arith.constant 0 : index
    %c0_13 = arith.constant 0 : index
    %17 = vector.load %arg6[%c0_12, %c0_13] : memref<32x128xbf16, #tpu.memory_space<vmem>>, vector<32x128xbf16>
    %cst_14 = arith.constant dense<0.000000e+00> : vector<8x128xf32>
    %18 = tpu.matmul %16, %17, %cst_14 {dimension_numbers = #tpu.dot_dimension_numbers<[1], [0], [0], [1], [0, 0, 1, 1], [], []>} : vector<8x32xbf16>, vector<32x128xbf16>, vector<8x128xf32> -> vector<8x128xf32>
    %c0_15 = arith.constant 0 : index
    %c0_16 = arith.constant 0 : index
    %19 = vector.load %arg7[%c0_15, %c0_16] : memref<1x128xf32, #tpu.memory_space<vmem>>, vector<1x128xf32>
    %20 = vector.broadcast %19 : vector<1x128xf32> to vector<8x128xf32>
    %21 = arith.addf %18, %20 : vector<8x128xf32>
    %c0_17 = arith.constant 0 : index
    %c0_18 = arith.constant 0 : index
    %22 = vector.load %arg8[%c0_17, %c0_18] : memref<8x128xf32, #tpu.memory_space<vmem>>, vector<8x128xf32>
    tpu.vector_store %arg8[%c0_17, %c0_18], %21 {strides = array<i32>} : memref<8x128xf32, #tpu.memory_space<vmem>>, vector<8x128xf32>,
    return
  }
  func.func @transform_0(%arg0: i32) -> (i32, i32) {
    %c0_i32 = arith.constant 0 : i32
    %c0_i32_0 = arith.constant 0 : i32
    return %arg0, %c0_i32 : i32, i32
  }
  func.func @transform_1(%arg0: i32) -> (i32, i32) {
    %c0_i32 = arith.constant 0 : i32
    %c0_i32_0 = arith.constant 0 : i32
    %c0_i32_1 = arith.constant 0 : i32
    return %c0_i32, %c0_i32_0 : i32, i32
  }
  func.func @transform_2(%arg0: i32) -> (i32, i32) {
    %c0_i32 = arith.constant 0 : i32
    %c0_i32_0 = arith.constant 0 : i32
    %c0_i32_1 = arith.constant 0 : i32
    return %c0_i32, %c0_i32_0 : i32, i32
  }
  func.func @transform_3(%arg0: i32) -> (i32, i32) {
    %c0_i32 = arith.constant 0 : i32
    %c0_i32_0 = arith.constant 0 : i32
    %c0_i32_1 = arith.constant 0 : i32
    return %c0_i32, %c0_i32_0 : i32, i32
  }
  func.func @transform_4(%arg0: i32) -> (i32, i32) {
    %c0_i32 = arith.constant 0 : i32
    %c0_i32_0 = arith.constant 0 : i32
    %c0_i32_1 = arith.constant 0 : i32
    return %c0_i32, %c0_i32_0 : i32, i32
  }
  func.func @transform_5(%arg0: i32) -> (i32, i32) {
    %c0_i32 = arith.constant 0 : i32
    %c0_i32_0 = arith.constant 0 : i32
    %c0_i32_1 = arith.constant 0 : i32
    return %c0_i32, %c0_i32_0 : i32, i32
  }
  func.func @transform_6(%arg0: i32) -> (i32, i32) {
    %c0_i32 = arith.constant 0 : i32
    %c0_i32_0 = arith.constant 0 : i32
    %c0_i32_1 = arith.constant 0 : i32
    return %c0_i32, %c0_i32_0 : i32, i32
  }
  func.func @transform_7(%arg0: i32) -> (i32, i32) {
    %c0_i32 = arith.constant 0 : i32
    %c0_i32_0 = arith.constant 0 : i32
    return %arg0, %c0_i32 : i32, i32
  }
}

</mosaic_0001>

<bundles_post_ra>
// kernel: tpu_custom_call.1
= control target key start
LH: loop header
LB: loop body
LE: loop exit
PB: predicated region body
PF: predicated region fallthrough
CT: control target
= control target key end

     0   :  { %v352_v1 = vmov 0.0   ;;  %vm353_vm0 = vmmov 0   ;;  %s448_s0 = inlined_call_operand.vmem [shape: bf16[8,64], index: 0, kind: input, shape index: {}]   ;;  %s449_s1 = inlined_call_operand.vmem [shape: bf16[64,32], index: 1, kind: input, shape index: {}]   ;;  %s450_s2 = inlined_call_operand.vmem [shape: f32[1,32], index: 2, kind: input, shape index: {}]   ;;  %s451_s3 = inlined_call_operand.vmem [shape: bf16[32,32], index: 3, kind: input, shape index: {}]   ;;  %s452_s4 = inlined_call_operand.vmem [shape: f32[1,32], index: 4, kind: input, shape index: {}]   ;;  %s453_s5 = inlined_call_operand.vmem [shape: bf16[32,128], index: 5, kind: input, shape index: {}]   ;;  %s454_s6 = inlined_call_operand.vmem [shape: f32[1,128], index: 6, kind: input, shape index: {}]   ;;  %s455_s7 = inlined_call_operand.hbm [shape: f32[8,128], index: 7, kind: output, shape index: {}]  }
   0x1   :  { %v320_v0 = vld [vmem:[%s449_s1] sm:$0xff]   ;;  %289 = vmatprep.subr.bf16.mxu0 %v352_v1  ;;  %301 = vmatprep.subr.bf16.mxu1 %v352_v1  ;;  %v321_v2 = vld [vmem:[%s449_s1 + $0x8] sm:$0xff]   ;;  %v322_v3 = vld [vmem:[%s449_s1 + $0x10] sm:$0xff]  }
   0x2   :  { %290 = vmatpush3.bf16.msra.mxu0 %v320_v0  ;;  %297 = vmatprep.mubr.msk.bf16.mxu0 %vm353_vm0, %v352_v1 }
   0x3   :  { %291 = vmatprep.subr.bf16.mxu0 %v352_v1  ;;  %305 = vmatprep.mubr.msk.bf16.mxu1 %vm353_vm0, %v352_v1 }
   0x6   :  { %292 = vmatpush3.bf16.msra.mxu0 %v321_v2 }
   0x7   :  { %293 = vmatprep.subr.bf16.mxu0 %v352_v1 }
   0x8   :  { %12 = vsyncpa [#allocation3], 0  ;;  %v323_v4 = vld [vmem:[%s449_s1 + $0x18] sm:$0xff]   ;;  %v28_v5 = vld [vmem:[%s448_s0] sm:$0xf]  ;;  %vm68_vm1 = vcmask 523264  }
   0x9   :  { %v324_v6 = vld [vmem:[%s451_s3] sm:$0xff]   ;;  %v325_v7 = vld [vmem:[%s451_s3 + $0x8] sm:$0xff]   ;;  %vm137_vm2 = vcmask 261120   ;;  %s354_s21 = smov [#allocation2]  }
   0xa   :  { %294 = vmatpush3.bf16.msra.mxu0 %v322_v3  ;;  %302 = vmatpush3.bf16.msra.mxu1 %v324_v6  ;;  %v264_v8 = vld [vmem:[%s450_s2] ss:$0 sm:$0xff]  ;;  %v327_v17 = vld [vmem:[%s453_s5 + $0x8] sm:$0xff]  }
   0xb   :  { %295 = vmatprep.subr.bf16.mxu0 %v352_v1  ;;  %303 = vmatprep.subr.bf16.mxu1 %v352_v1  ;;  %v326_v15 = vld [vmem:[%s453_s5] sm:$0xff]   ;;  %s256_s5 = sshll.u32 %s354_s21, 4  ;;  %s257_s5 = int_to_ptr.vmem [resolvable:$true] %s256_s5 }
   0xc   :  { %v270_v18 = vld [vmem:[%s452_s4] ss:$0 sm:$0xff]  ;;  %s328_s4 = scalar_lea.vmem %s257_s5, 128  ;;  %p333_p1 = scmp.lt.s32.totalorder %s257_s5, %s257_s5 }
   0xd   :  { %v274_v26 = vld [vmem:[%s454_s6] ss:$0 sm:$0xff]  ;;  %p329_p0 = scmp.ne.s32.totalorder %s257_s5, %s328_s4  ;;  %p334_p2 = scmp.lt.s32.totalorder %s328_s4, %s328_s4 }
   0xe   :  { %296 = vmatpush3.bf16.msra.mxu0 %v323_v4  ;;  %304 = vmatpush3.bf16.msra.mxu1 %v325_v7 }
   0xf   :  { %309 = vmatprep.subr.bf16.mxu1 %v352_v1  ;;  %p335_p3 = por %p334_p2, %p333_p1 }
  0x11   :  { %298 = vmatmul.mubr.msk.bf16.vlgmr.msra.gmra.mrb[0].mxu0 %vm68_vm1, %v28_v5  ;;  %p336_p4 = pnand %p335_p3, %p329_p0 }
  0xe4   :  { %v106_v9 = vpop.f32.mrb[0].mxu0 }
  0xe5   :  { %v107_v10 = vadd.f32 %v264_v8, %v106_v9  ;;  %v299_v11 = vpop.f32.mrb[1].mxu0 }
  0xe6   :  { %v109_v12 = vpop.f32.mrb[2].mxu0 }
  0xe7   :  { %v112_v13 = vmax.f32 %v107_v10, 0.0  ;;  %v300_v14 = vpop.f32.mrb[3].mxu0 }
  0xe9   :  { %v113_v16 = vpack.c.bf16 %v112_v13, %v112_v13 }
  0xeb   :  { %306 = vmatmul.mubr.msk.bf16.vlgmr.msra.gmra.mrb[0].mxu1 %vm137_vm2, %v113_v16 }
  0xec   :  { %310 = vmatpush3.bf16.msra.mxu1 %v326_v15  ;;  %313 = vmatprep.mubr.msk.bf16.mxu1 %vm353_vm0, %v352_v1 }
  0xed   :  { %311 = vmatprep.subr.bf16.mxu1 %v352_v1 }
  0xf0   :  { %312 = vmatpush3.bf16.msra.mxu1 %v327_v17 }
 0x1be   :  { %v175_v19 = vpop.f32.mrb[0].mxu1 }
 0x1bf   :  { %v176_v20 = vadd.f32 %v270_v18, %v175_v19  ;;  %v307_v21 = vpop.f32.mrb[1].mxu1 }
 0x1c0   :  { %v178_v22 = vpop.f32.mrb[2].mxu1 }
 0x1c1   :  { %v181_v23 = vmax.f32 %v176_v20, 0.0  ;;  %v308_v24 = vpop.f32.mrb[3].mxu1 }
 0x1c3   :  { %v182_v25 = vpack.c.bf16 %v181_v23, %v181_v23 }
 0x1c5   :  { %314 = vmatmul.mubr.msk.bf16.vlgmr.msra.gmra.mrb[4].mxu1 %vm137_vm2, %v182_v25 }
 0x298   :  { %v243_v27 = vpop.f32.mrb[4].mxu1 }
 0x299   :  { %v244_v28 = vadd.f32 %v274_v26, %v243_v27  ;;  %v315_v29 = vpop.f32.mrb[5].mxu1 }
 0x29a   :  { %v246_v30 = vpop.f32.mrb[6].mxu1 }
 0x29b   :  { %249 = vst [vmem:[#allocation2] sm:$0xff] %v244_v28  ;;  %v316_v31 = vpop.f32.mrb[7].mxu1 }
 0x29c   :  { %339 = shalt.err (!%p336_p4)
}
 0x29d   :  { %s340_s6 = scalar_lea.hbm %s455_s7, 128 }
 0x29e   :  { %p341_p5 = scmp.ne.s32.totalorder %s455_s7, %s340_s6  ;;  %p344_p6 = scmp.lt.u32.totalorder %s340_s6, %s455_s7 }
 0x2a0   :  { %p346_p7 = pnand %p344_p6, %p341_p5 }
 0x2a2   :  { %349 = shalt.err (!%p346_p7)
}
 0x2a3   :  { %259 = dma.vmem_to_hbm [thread:$0]  %s257_s5, 128, %s455_s7, [#allocation3]  }
 0x2a4   :  { %350 = dma.done.wait [#allocation3], 128  }
 0x2a5   :  { %351 = vsyncadd [#allocation3], 4294967168 }
 0x2a6   :  { %263 = vsyncpa [#allocation3], 1 }

</bundles_post_ra>
